<compile_context>
chip_gen: v6e
topology: v6e:2x2x1
jax: 0.10.0
libtpu: 0.0.40
codegen_flags: <defaults>
</compile_context>

<pallas_src>
import jax
import jax.numpy as jnp
from jax import lax
from jax.experimental import pallas as pl
from jax.experimental.pallas import tpu as pltpu

_LANE = 128


def _round_up(x, m):
    return (x + m - 1) // m * m


def _pick_tile(n_p, pref, lane=_LANE):
    """Largest lane-multiple that divides n_p and is <= pref (n_p % lane == 0)."""
    t = min(_round_up(pref, lane), n_p)
    t = (t // lane) * lane
    while n_p % t != 0:
        t -= lane
    return t


def gcn_layer_kernel(adj_ref, x_ref, wt_ref, b_ref, o_ref, acc_ref):
    """One (row-tile i, k-tile) grid step of ReLU((A @ X) @ W^T + b).

    adj_ref: (tm, tk) int8 (exact 0/1/2) -> upcast to bf16 in-register.
    x_ref:   (tk, F_in) bf16.
    Both matmuls are bf16 x bf16 with f32 accumulation (MXU native).
    """
    k = pl.program_id(1)

    a = adj_ref[...].astype(jnp.bfloat16)           # cheap VPU cast, halves A HBM stream
    partial = jnp.dot(a, x_ref[...], preferred_element_type=jnp.float32)

    @pl.when(k == 0)
    def _():
        acc_ref[...] = partial                      # assign (no zero-init RMW)

    @pl.when(k > 0)
    def _():
        acc_ref[...] += partial

    @pl.when(k == pl.num_programs(1) - 1)
    def _():
        z = jnp.dot(acc_ref[...].astype(jnp.bfloat16), wt_ref[...],
                    preferred_element_type=jnp.float32) + b_ref[...]
        o_ref[...] = jnp.maximum(z, 0.0).astype(o_ref.dtype)


def _gcn_layer_padded(adj_p, x_p, wt_p, b_p, *, tm, tk):
    """One GCN layer on already-padded operands.

    adj_p: (n_p, n_p) int8   x_p: (n_p, f_in_p) bf16
    wt_p:  (f_in_p, f_out_p) bf16   b_p: (1, f_out_p) f32
    Returns padded (n_p, f_out_p) bf16 activations.
    """
    n_p = adj_p.shape[0]
    f_in_p = x_p.shape[1]
    f_out_p = wt_p.shape[1]
    grid = (n_p // tm, n_p // tk)

    # Honest cost estimate: X is re-streamed once per row tile unless resident.
    x_fetches = grid[0] if grid[1] > 1 else 1
    flops = 2.0 * n_p * n_p * f_in_p + 2.0 * n_p * f_in_p * f_out_p
    bytes_accessed = (adj_p.size * 1                       # int8 A
                      + x_fetches * x_p.size * 2           # bf16 X (re-)stream
                      + wt_p.size * 2 + b_p.size * 4
                      + n_p * f_out_p * 2)                 # bf16 output write
    cost = pl.CostEstimate(flops=int(flops), transcendentals=0,
                           bytes_accessed=int(bytes_accessed))

    # Double-buffered inputs/output + f32 accumulator scratch.
    vmem_bytes = (2 * (tm * tk * 1 + tk * f_in_p * 2 + f_in_p * f_out_p * 2
                       + f_out_p * 4 + tm * f_out_p * 2)
                  + tm * f_in_p * 4)
    vmem_limit = int(min(max(2 * vmem_bytes, 16 << 20), 48 << 20))

    return pl.pallas_call(
        gcn_layer_kernel,
        out_shape=jax.ShapeDtypeStruct((n_p, f_out_p), jnp.bfloat16),
        grid_spec=pltpu.PrefetchScalarGridSpec(
            num_scalar_prefetch=0,
            grid=grid,
            in_specs=[
                pl.BlockSpec((tm, tk), lambda i, k: (i, k)),           # A streams
                pl.BlockSpec((tk, f_in_p), lambda i, k: (k, 0)),       # X (resident if tk==n_p)
                pl.BlockSpec((f_in_p, f_out_p), lambda i, k: (0, 0)),  # W^T resident
                pl.BlockSpec((1, f_out_p), lambda i, k: (0, 0)),       # bias resident
            ],
            out_specs=pl.BlockSpec((tm, f_out_p), lambda i, k: (i, 0)),
            scratch_shapes=[pltpu.VMEM((tm, f_in_p), jnp.float32)],
        ),
        compiler_params=pltpu.CompilerParams(
            dimension_semantics=("parallel", "arbitrary"),
            vmem_limit_bytes=vmem_limit),
        cost_estimate=cost,
    )(adj_p, x_p, wt_p, b_p)


def gcn_net(adj, features, params, *, tm=512, tk=1024):
    """GCNNet.forward: add self-loops once, then two GCN layers with ReLU.

    adj:      [N, N] dense adjacency, adj[v, u] = edge multiplicity u -> v
    features: [N, F_in] node features
    params:   w1 [F_h, F_in], b1 [F_h], w2 [F_out, F_h], b2 [F_out] (nn.Linear layout)
    Returns f32 [N, F_out].
    """
    n, f_in = features.shape
    f_hid = params["w1"].shape[0]
    f_out = params["w2"].shape[0]

    # Pad N once (rows == cols so layer-1's padded activations feed layer 2).
    n_p = _round_up(n, _LANE)
    tm = _pick_tile(n_p, tm)
    tk = _pick_tile(n_p, tk)
    if n_p // tm < 2 and n_p // _LANE >= 2:    # keep >= 2 row tiles for v7x megacore
        tm = _pick_tile(n_p, n_p // 2)

    # Adjacency (+ self-loops, as g.add_edges(g.nodes(), g.nodes())) prepared
    # ONCE, stored int8 (edge multiplicities 0/1/2 are exact), padded once, and
    # shared by both layers.
    adj_sl = adj.astype(jnp.int8) + jnp.eye(n, dtype=jnp.int8)
    adj_p = jnp.pad(adj_sl, ((0, n_p - n), (0, n_p - n)))

    f_in_p = _round_up(f_in, _LANE)
    f_hid_p = _round_up(f_hid, _LANE)
    f_out_p = _round_up(f_out, _LANE)

    x_p = jnp.pad(features.astype(jnp.bfloat16),
                  ((0, n_p - n), (0, f_in_p - f_in)))
    w1t_p = jnp.pad(params["w1"].T.astype(jnp.bfloat16),
                    ((0, f_in_p - f_in), (0, f_hid_p - f_hid)))
    b1_p = jnp.pad(params["b1"].astype(jnp.float32),
                   (0, f_hid_p - f_hid)).reshape(1, f_hid_p)
    w2t_p = jnp.pad(params["w2"].T.astype(jnp.bfloat16),
                    ((0, f_hid_p - f_hid), (0, f_out_p - f_out)))
    b2_p = jnp.pad(params["b2"].astype(jnp.float32),
                   (0, f_out_p - f_out)).reshape(1, f_out_p)

    # Layer 1 output stays padded bf16 and feeds layer 2 directly.
    h1_p = _gcn_layer_padded(adj_p, x_p, w1t_p, b1_p, tm=tm, tk=tk)
    h2_p = _gcn_layer_padded(adj_p, h1_p, w2t_p, b2_p, tm=tm, tk=tk)

    return h2_p[:n, :f_out].astype(jnp.float32)


if __name__ == "__main__":
    key = jax.random.PRNGKey(0)
    k_feat, k_w1, k_b1, k_w2, k_b2, k_adj = jax.random.split(key, 6)

    # Shapes consistent with GCNNet (GCNLayer(300, 300) twice). N=256 with the
    # auto-picked 128-row tiles gives a 2-wide parallel row axis.
    N = 256
    F = 300

    x = jax.random.normal(k_feat, (N, F), dtype=jnp.float32)
    w1 = jax.random.normal(k_w1, (F, F), dtype=jnp.float32) / jnp.sqrt(float(F))
    b1 = jax.random.normal(k_b1, (F,), dtype=jnp.float32) * 0.1
    w2 = jax.random.normal(k_w2, (F, F), dtype=jnp.float32) / jnp.sqrt(float(F))
    b2 = jax.random.normal(k_b2, (F,), dtype=jnp.float32) * 0.1
    # Dense 0/1 adjacency: adj[v, u] = 1 means edge u -> v.
    adj = (jax.random.uniform(k_adj, (N, N)) < 0.05).astype(jnp.float32)

    params = dict(w1=w1, b1=b1, w2=w2, b2=b2)
    out = jax.jit(gcn_net)(adj, x, params)
    jax.block_until_ready(out)

    # Pure-JAX f32 reference (same self-loop handling).
    adj_sl = adj + jnp.eye(N, dtype=jnp.float32)
    hp = lax.Precision.HIGHEST
    h1 = jnp.maximum(
        jnp.dot(jnp.dot(adj_sl, x, precision=hp), w1.T, precision=hp) + b1, 0.0)
    ref = jnp.maximum(
        jnp.dot(jnp.dot(adj_sl, h1, precision=hp), w2.T, precision=hp) + b2, 0.0)

    assert out.shape == (N, F)
    err = float(jnp.max(jnp.abs(out - ref)))
    scale = float(jnp.max(jnp.abs(ref)))
    # bf16 operands with f32 accumulation: ~1% relative-to-max error expected
    # after two layers vs the HIGHEST-precision f32 reference.
    assert err <= 2e-2 * scale + 1e-3, (err, scale)

    print("KERNEL_OK")
</pallas_src>

<mosaic_0001>
module attributes {stable_mosaic.version = 11 : i64} {
  func.func @gcn_layer_kernel(%arg0: i32, %arg1: i32, %arg2: memref<128x256xi8, #tpu.memory_space<vmem>>, %arg3: memref<256x384xbf16, #tpu.memory_space<vmem>>, %arg4: memref<384x384xbf16, #tpu.memory_space<vmem>>, %arg5: memref<1x384xf32, #tpu.memory_space<vmem>>, %arg6: memref<128x384xbf16, #tpu.memory_space<vmem>>, %arg7: memref<128x384xf32, #tpu.memory_space<vmem>>) attributes {dimension_semantics = [#tpu.dimension_semantics<parallel>, #tpu.dimension_semantics<arbitrary>], iteration_bounds = array<i64: 2, 1>, scalar_prefetch = 0 : i64, scratch_operands = 1 : i64, tpu.core_type = #tpu.core_type<tc>, window_params = [{transform_indices = @transform_0, window_bounds = array<i64: 128, 256>}, {transform_indices = @transform_1, window_bounds = array<i64: 256, 384>}, {pipeline_mode = #tpu.pipeline_mode<synchronous>, transform_indices = @transform_2, window_bounds = array<i64: 384, 384>}, {pipeline_mode = #tpu.pipeline_mode<synchronous>, transform_indices = @transform_3, window_bounds = array<i64: 1, 384>}, {transform_indices = @transform_4, window_bounds = array<i64: 128, 384>}]} {
    %c0 = arith.constant 0 : index
    %c0_0 = arith.constant 0 : index
    %0 = vector.load %arg2[%c0, %c0_0] : memref<128x256xi8, #tpu.memory_space<vmem>>, vector<128x256xi8>
    %1 = arith.sitofp %0 : vector<128x256xi8> to vector<128x256xbf16>
    %c0_1 = arith.constant 0 : index
    %c0_2 = arith.constant 0 : index
    %2 = vector.load %arg3[%c0_1, %c0_2] : memref<256x384xbf16, #tpu.memory_space<vmem>>, vector<256x384xbf16>
    %cst = arith.constant dense<0.000000e+00> : vector<128x384xf32>
    %3 = tpu.matmul %1, %2, %cst {dimension_numbers = #tpu.dot_dimension_numbers<[1], [0], [0], [1], [0, 0, 1, 1], [], []>} : vector<128x256xbf16>, vector<256x384xbf16>, vector<128x384xf32> -> vector<128x384xf32>
    %c0_i32 = arith.constant 0 : i32
    %4 = arith.cmpi eq, %arg1, %c0_i32 : i32
    %5 = arith.extui %4 : i1 to i32
    %c0_i32_3 = arith.constant 0 : i32
    %6 = arith.cmpi ne, %5, %c0_i32_3 : i32
    scf.if %6 {
      %c0_8 = arith.constant 0 : index
      %c0_9 = arith.constant 0 : index
      %13 = vector.load %arg7[%c0_8, %c0_9] : memref<128x384xf32, #tpu.memory_space<vmem>>, vector<128x384xf32>
      tpu.vector_store %arg7[%c0_8, %c0_9], %3 {strides = array<i32>} : memref<128x384xf32, #tpu.memory_space<vmem>>, vector<128x384xf32>,
    } else {
    }
    %c0_i32_4 = arith.constant 0 : i32
    %7 = arith.cmpi sgt, %arg1, %c0_i32_4 : i32
    %8 = arith.extui %7 : i1 to i32
    %c0_i32_5 = arith.constant 0 : i32
    %9 = arith.cmpi ne, %8, %c0_i32_5 : i32
    scf.if %9 {
      %c0_8 = arith.constant 0 : index
      %c0_9 = arith.constant 0 : index
      %13 = vector.load %arg7[%c0_8, %c0_9] : memref<128x384xf32, #tpu.memory_space<vmem>>, vector<128x384xf32>
      %14 = arith.addf %13, %3 : vector<128x384xf32>
      %c0_10 = arith.constant 0 : index
      %c0_11 = arith.constant 0 : index
      %15 = vector.load %arg7[%c0_10, %c0_11] : memref<128x384xf32, #tpu.memory_space<vmem>>, vector<128x384xf32>
      tpu.vector_store %arg7[%c0_10, %c0_11], %14 {strides = array<i32>} : memref<128x384xf32, #tpu.memory_space<vmem>>, vector<128x384xf32>,
    } else {
    }
    %c0_i32_6 = arith.constant 0 : i32
    %10 = arith.cmpi eq, %arg1, %c0_i32_6 : i32
    %11 = arith.extui %10 : i1 to i32
    %c0_i32_7 = arith.constant 0 : i32
    %12 = arith.cmpi ne, %11, %c0_i32_7 : i32
    scf.if %12 {
      %c0_8 = arith.constant 0 : index
      %c0_9 = arith.constant 0 : index
      %13 = vector.load %arg7[%c0_8, %c0_9] : memref<128x384xf32, #tpu.memory_space<vmem>>, vector<128x384xf32>
      %14 = arith.truncf %13 : vector<128x384xf32> to vector<128x384xbf16>
      %c0_10 = arith.constant 0 : index
      %c0_11 = arith.constant 0 : index
      %15 = vector.load %arg4[%c0_10, %c0_11] : memref<384x384xbf16, #tpu.memory_space<vmem>>, vector<384x384xbf16>
      %cst_12 = arith.constant dense<0.000000e+00> : vector<128x384xf32>
      %16 = tpu.matmul %14, %15, %cst_12 {dimension_numbers = #tpu.dot_dimension_numbers<[1], [0], [0], [1], [0, 0, 1, 1], [], []>} : vector<128x384xbf16>, vector<384x384xbf16>, vector<128x384xf32> -> vector<128x384xf32>
      %c0_13 = arith.constant 0 : index
      %c0_14 = arith.constant 0 : index
      %17 = vector.load %arg5[%c0_13, %c0_14] : memref<1x384xf32, #tpu.memory_space<vmem>>, vector<1x384xf32>
      %18 = vector.broadcast %17 : vector<1x384xf32> to vector<128x384xf32>
      %19 = arith.addf %16, %18 : vector<128x384xf32>
      %cst_15 = arith.constant 0.000000e+00 : f32
      %20 = vector.broadcast %cst_15 : f32 to vector<128x384xf32>
      %21 = arith.maximumf %19, %20 : vector<128x384xf32>
      %22 = arith.truncf %21 : vector<128x384xf32> to vector<128x384xbf16>
      %c0_16 = arith.constant 0 : index
      %c0_17 = arith.constant 0 : index
      %23 = vector.load %arg6[%c0_16, %c0_17] : memref<128x384xbf16, #tpu.memory_space<vmem>>, vector<128x384xbf16>
      tpu.vector_store %arg6[%c0_16, %c0_17], %22 {strides = array<i32>} : memref<128x384xbf16, #tpu.memory_space<vmem>>, vector<128x384xbf16>,
    } else {
    }
    return
  }
  func.func @transform_0(%arg0: i32, %arg1: i32) -> (i32, i32) {
    %c0_i32 = arith.constant 0 : i32
    return %arg0, %arg1 : i32, i32
  }
  func.func @transform_1(%arg0: i32, %arg1: i32) -> (i32, i32) {
    %c0_i32 = arith.constant 0 : i32
    %c0_i32_0 = arith.constant 0 : i32
    return %arg1, %c0_i32 : i32, i32
  }
  func.func @transform_2(%arg0: i32, %arg1: i32) -> (i32, i32) {
    %c0_i32 = arith.constant 0 : i32
    %c0_i32_0 = arith.constant 0 : i32
    %c0_i32_1 = arith.constant 0 : i32
    return %c0_i32, %c0_i32_0 : i32, i32
  }
  func.func @transform_3(%arg0: i32, %arg1: i32) -> (i32, i32) {
    %c0_i32 = arith.constant 0 : i32
    %c0_i32_0 = arith.constant 0 : i32
    %c0_i32_1 = arith.constant 0 : i32
    return %c0_i32, %c0_i32_0 : i32, i32
  }
  func.func @transform_4(%arg0: i32, %arg1: i32) -> (i32, i32) {
    %c0_i32 = arith.constant 0 : i32
    %c0_i32_0 = arith.constant 0 : i32
    return %arg0, %c0_i32 : i32, i32
  }
}

</mosaic_0001>

<bundles_post_ra>
// kernel: gcn_net.2
= control target key start
LH: loop header
LB: loop body
LE: loop exit
PB: predicated region body
PF: predicated region fallthrough
CT: control target
= control target key end

     0   :  { %s2944_s15 = smov 0   ;;  %s2946_s16 = smov 0   ;;  %s3612_s0 = inlined_call_operand.vmem [shape: s8[256,256], index: 0, kind: input, shape index: {}]   ;;  %s3613_s1 = inlined_call_operand.vmem [shape: bf16[256,384], index: 1, kind: input, shape index: {}]   ;;  %s3614_s2 = inlined_call_operand.vmem [shape: bf16[384,384], index: 2, kind: input, shape index: {}]   ;;  %s3615_s3 = inlined_call_operand.vmem [shape: f32[1,384], index: 3, kind: input, shape index: {}]   ;;  %s3616_s4 = inlined_call_operand.vmem [shape: bf16[256,384], index: 4, kind: output, shape index: {}]  }
   0x1   :  { %s2948_s17 = smov 0  }
   0x2 LB: > { %s26_s18 = sadd.s32 1, %s2912_s16  ;;  %p2339_p0 = scmp.ge.s32.totalorder %s2916_s17, 1  ;;  %s2916_s17 = sphi %s2948_s17, %s14_s17   ;;  %s2912_s16 = sphi %s2946_s16, %s3618_s16   ;;  %s2908_s15 = sphi %s2944_s15, %s3617_s15  }
   0x3   : > { %p28_p1 = scmp.ge.s32.totalorder %s26_s18, 2  ;;  %p195_p2 = scmp.lt.s32.totalorder %s2916_s17, 3 }
   0x5   : > { %s3620_s18 = smov (%p28_p1, %s26_s18), 0  ;;  %p196_p3 = pnand %p2339_p0, %p195_p2 }
   0x6   : > { %s2340_s11 = sshll.u32 (!%p196_p3), %s2908_s15, 2  ;;  %s2343_s26 = sshll.u32 (!%p196_p3), %s2908_s15, 4 }
   0x7   : > { %199 = sbr.rel (%p196_p3) target bundleno = 609 (0x261), region = 36  ;;  %p235_p4 = scmp.lt.s32.totalorder (!%p196_p3), %s2340_s11, 7 }
   0x8   : > { %p253_p5 = scmp.lt.s32.totalorder (!%p196_p3), %s2343_s26, 31 }
   0xc   : > { %v2734_v0 = vld [vmem:[%s3613_s1 + $0xac] ss:$12 sps:$4 sm:$0xff]   ;;  %v2736_v1 = vld [vmem:[%s3613_s1 + $0x170] ss:$12 sps:$4 sm:$0xff]   ;;  %v2737_v2 = vld [vmem:[%s3613_s1 + $0xa8] ss:$12 sps:$4 sm:$0xff]  }
   0xd   : > { %604 = vmatprep.subr.bf16.mxu0 %v2734_v0  ;;  %2532 = vmatprep.subr.bf16.mxu1 %v2736_v1  ;;  %v2738_v3 = vld [vmem:[%s3613_s1 + $0xb0] ss:$12 sps:$4 sm:$0xff]   ;;  %v2739_v4 = vld [vmem:[%s3613_s1 + $0x94] ss:$12 sps:$4 sm:$0xff]   ;;  %v2741_v5 = vld [vmem:[%s3613_s1 + $0x158] ss:$12 sps:$4 sm:$0xff]  }
   0xe   : > { %605 = vmatpush1.bf16.msra.mxu0 %v2737_v2  ;;  %2533 = vmatpush3.bf16.msra.mxu1 %v2738_v3  ;;  %v2742_v6 = vld [vmem:[%s3613_s1 + $0x90] ss:$12 sps:$4 sm:$0xff]   ;;  %v2743_v7 = vld [vmem:[%s3613_s1 + $0x98] ss:$12 sps:$4 sm:$0xff]   ;;  %v2746_v9 = vld [vmem:[%s3613_s1 + $0x140] ss:$12 sps:$4 sm:$0xff]  }
   0xf   : > { %606 = vmatprep.subr.bf16.mxu0 %v2739_v4  ;;  %2534 = vmatprep.subr.bf16.mxu1 %v2741_v5  ;;  %v2744_v8 = vld [vmem:[%s3613_s1 + $0x7c] ss:$12 sps:$4 sm:$0xff]   ;;  %v2747_v10 = vld [vmem:[%s3613_s1 + $0x78] ss:$12 sps:$4 sm:$0xff]   ;;  %v2748_v11 = vld [vmem:[%s3613_s1 + $0x80] ss:$12 sps:$4 sm:$0xff]  }
  0x10   : > { %v2749_v12 = vld [vmem:[%s3613_s1 + $0x64] ss:$12 sps:$4 sm:$0xff]   ;;  %v2751_v13 = vld [vmem:[%s3613_s1 + $0x128] ss:$12 sps:$4 sm:$0xff]   ;;  %v2752_v14 = vld [vmem:[%s3613_s1 + $0x60] ss:$12 sps:$4 sm:$0xff]  }
  0x11   : > { %v2753_v15 = vld [vmem:[%s3613_s1 + $0x68] ss:$12 sps:$4 sm:$0xff]   ;;  %v2754_v16 = vld [vmem:[%s3613_s1 + $0x4c] ss:$12 sps:$4 sm:$0xff]   ;;  %v2756_v17 = vld [vmem:[%s3613_s1 + $0x110] ss:$12 sps:$4 sm:$0xff]  }
  0x12   : > { %607 = vmatpush1.bf16.msra.mxu0 %v2742_v6  ;;  %2535 = vmatpush3.bf16.msra.mxu1 %v2743_v7  ;;  %v2757_v18 = vld [vmem:[%s3613_s1 + $0x48] ss:$12 sps:$4 sm:$0xff]   ;;  %v2758_v19 = vld [vmem:[%s3613_s1 + $0x50] ss:$12 sps:$4 sm:$0xff]   ;;  %s3622_s11 = smov (!%p235_p4, %s2340_s11), 7  ;;  %s3624_s26 = smov (!%p253_p5, %s2343_s26), 31 }
  0x13   : > { %608 = vmatprep.subr.bf16.mxu0 %v2744_v8  ;;  %2536 = vmatprep.subr.bf16.mxu1 %v2746_v9  ;;  %v2759_v20 = vld [vmem:[%s3613_s1 + $0x34] ss:$12 sps:$4 sm:$0xff]   ;;  %v2761_v21 = vld [vmem:[%s3613_s1 + $0xf8] ss:$12 sps:$4 sm:$0xff]   ;;  %v2762_v22 = vld [vmem:[%s3613_s1 + $0x30] ss:$12 sps:$4 sm:$0xff]  }
  0x14   : > { %v2763_v23 = vld [vmem:[%s3613_s1 + $0x38] ss:$12 sps:$4 sm:$0xff]   ;;  %s2499_s25 = sshll.u32 %s3622_s11, 4  ;;  %v2764_v24 = vld [vmem:[%s3613_s1 + $0x1c] ss:$12 sps:$4 sm:$0xff]   ;;  %s2708_s15 = smul.u32 12, %s3624_s26 }
  0x15   : > { %v2766_v25 = vld [vmem:[%s3613_s1 + $0xe0] ss:$12 sps:$4 sm:$0xff]   ;;  %s3046_s6 = scalar_lea.vmem %s3612_s0, %s2499_s25  ;;  %v2767_v26 = vld [vmem:[%s3613_s1 + $0x18] ss:$12 sps:$4 sm:$0xff]   ;;  %v2771_v29 = vld [vmem:[%s3613_s1 + $0xc8] ss:$12 sps:$4 sm:$0xff]  }
  0x16   : > { %609 = vmatpush1.bf16.msra.mxu0 %v2747_v10  ;;  %2537 = vmatpush3.bf16.msra.mxu1 %v2748_v11  ;;  %v2768_v27 = vld [vmem:[%s3613_s1 + $0x20] ss:$12 sps:$4 sm:$0xff]   ;;  %v2769_v28 = vld [vmem:[%s3613_s1 + $0x4] ss:$12 sps:$4 sm:$0xff]   ;;  %v2773_v33 = vld [vmem:[%s3613_s1 + $0x8] ss:$12 sps:$4 sm:$0xff]   ;;  %s3495_s5 = scalar_lea.vmem %s3616_s4, %s2708_s15 }
  0x17   : > { %610 = vmatprep.subr.bf16.mxu0 %v2749_v12  ;;  %2538 = vmatprep.subr.bf16.mxu1 %v2751_v13  ;;  %v3061_v30 = vld [vmem:[%s3046_s6 + $0x8] sm:$0xff]  ;;  %v3074_v35 = vld [vmem:[%s3046_s6] sm:$0xff]  ;;  %v2779_v40 = vld [vmem:[%s3613_s1 + $0x150] ss:$12 sps:$4 sm:$0xff]  }
  0x18   : > { %v269_v31 = vunpack.c.l.s8.bf16 %v3061_v30  ;;  %v2772_v32 = vld [vmem:[%s3613_s1] ss:$12 sps:$4 sm:$0xff]   ;;  %v268_v36 = vunpack.c.l.s8.bf16 %v3074_v35  ;;  %v2776_v37 = vld [vmem:[%s3613_s1 + $0x168] ss:$12 sps:$4 sm:$0xff]   ;;  %v271_v38 = vunpack.c.h.s8.bf16 %v3061_v30  ;;  %v3095_v42 = vld [vmem:[%s3046_s6 + $0x18] sm:$0xff]  ;;  %v270_v44 = vunpack.c.h.s8.bf16 %v3074_v35 }
  0x19   : > { %v2774_v34 = vld [vmem:[%s3613_s1 + $0x16c] ss:$12 sps:$4 sm:$0xff]   ;;  %v2777_v39 = vld [vmem:[%s3613_s1 + $0x154] ss:$12 sps:$4 sm:$0xff]   ;;  %v2780_v41 = vld [vmem:[%s3613_s1 + $0x13c] ss:$12 sps:$4 sm:$0xff]   ;;  %v273_v46 = vunpack.c.l.s8.bf16 %v3095_v42  ;;  %v275_v58 = vunpack.c.h.s8.bf16 %v3095_v42 }
  0x1a   : > { %611 = vmatpush1.bf16.msra.mxu0 %v2752_v14  ;;  %2539 = vmatpush3.bf16.msra.mxu1 %v2753_v15  ;;  %v2782_v43 = vld [vmem:[%s3613_s1 + $0x138] ss:$12 sps:$4 sm:$0xff]   ;;  %v2798_v48 = vld [vmem:[%s3614_s2 + $0xa8] ss:$12 sps:$4 sm:$0xff]   ;;  %v2785_v49 = vld [vmem:[%s3613_s1 + $0x120] ss:$12 sps:$4 sm:$0xff]  }
  0x1b   : > { %612 = vmatprep.subr.bf16.mxu0 %v2754_v16  ;;  %2540 = vmatprep.subr.bf16.mxu1 %v2756_v17  ;;  %v2783_v45 = vld [vmem:[%s3613_s1 + $0x124] ss:$12 sps:$4 sm:$0xff]   ;;  %v2800_v47 = vld [vmem:[%s3614_s2 + $0xac] ss:$12 sps:$4 sm:$0xff]   ;;  %v2806_v50 = vld [vmem:[%s3614_s2 + $0x94] ss:$12 sps:$4 sm:$0xff]  }
  0x1c   : > { %749 = vmatprep.mubr.bf16.mxu1 %v269_v31  ;;  %636 = vmatprep.mubr.bf16.mxu0 %v269_v31  ;;  %v2786_v51 = vld [vmem:[%s3613_s1 + $0x10c] ss:$12 sps:$4 sm:$0xff]   ;;  %v3125_v52 = vld [vmem:[%s3046_s6 + $0x10] sm:$0xff]  ;;  %v2812_v54 = vld [vmem:[%s3614_s2 + $0x7c] ss:$12 sps:$4 sm:$0xff]  }
  0x1d   : > { %v2804_v53 = vld [vmem:[%s3614_s2 + $0x90] ss:$12 sps:$4 sm:$0xff]   ;;  %v272_v55 = vunpack.c.l.s8.bf16 %v3125_v52  ;;  %v2788_v56 = vld [vmem:[%s3613_s1 + $0x108] ss:$12 sps:$4 sm:$0xff]   ;;  %v2810_v59 = vld [vmem:[%s3614_s2 + $0x78] ss:$12 sps:$4 sm:$0xff]   ;;  %v274_v4 = vunpack.c.h.s8.bf16 %v3125_v52 }
  0x1e   : > { %613 = vmatpush1.bf16.msra.mxu0 %v2757_v18  ;;  %2541 = vmatpush3.bf16.msra.mxu1 %v2758_v19  ;;  %v2789_v57 = vld [vmem:[%s3613_s1 + $0xf4] ss:$12 sps:$4 sm:$0xff]   ;;  %v2818_v60 = vld [vmem:[%s3614_s2 + $0x64] ss:$12 sps:$4 sm:$0xff]   ;;  %v2792_v62 = vld [vmem:[%s3613_s1 + $0xdc] ss:$12 sps:$4 sm:$0xff]  }
  0x1f   : > { %614 = vmatprep.subr.bf16.mxu0 %v2759_v20  ;;  %2542 = vmatprep.subr.bf16.mxu1 %v2761_v21  ;;  %v2791_v61 = vld [vmem:[%s3613_s1 + $0xf0] ss:$12 sps:$4 sm:$0xff]   ;;  %v2794_v63 = vld [vmem:[%s3613_s1 + $0xd8] ss:$12 sps:$4 sm:$0xff]   ;;  %v3161_v0 = vld [vmem:[%s3046_s6 + $0x28] sm:$0xff] }
  0x20   : > { %v2816_v1 = vld [vmem:[%s3614_s2 + $0x60] ss:$12 sps:$4 sm:$0xff]   ;;  %v2795_v2 = vld [vmem:[%s3613_s1 + $0xc4] ss:$12 sps:$4 sm:$0xff]   ;;  %v2822_v5 = vld [vmem:[%s3614_s2 + $0x48] ss:$12 sps:$4 sm:$0xff]   ;;  %v277_v6 = vunpack.c.l.s8.bf16 %v3161_v0  ;;  %v279_v15 = vunpack.c.h.s8.bf16 %v3161_v0 }
  0x21   : > { %v2824_v3 = vld [vmem:[%s3614_s2 + $0x4c] ss:$12 sps:$4 sm:$0xff]   ;;  %v2830_v7 = vld [vmem:[%s3614_s2 + $0x34] ss:$12 sps:$4 sm:$0xff]   ;;  %v2828_v11 = vld [vmem:[%s3614_s2 + $0x30] ss:$12 sps:$4 sm:$0xff]  }
  0x22   : > { %615 = vmatpush1.bf16.msra.mxu0 %v2762_v22  ;;  %2543 = vmatpush3.bf16.msra.mxu1 %v2763_v23  ;;  %v2797_v8 = vld [vmem:[%s3613_s1 + $0xc0] ss:$12 sps:$4 sm:$0xff]   ;;  %v2801_v12 = vld [vmem:[%s3614_s2 + $0x228] ss:$12 sps:$4 sm:$0xff]   ;;  %v2807_v16 = vld [vmem:[%s3614_s2 + $0x210] ss:$12 sps:$4 sm:$0xff]  }
  0x23   : > { %616 = vmatprep.subr.bf16.mxu0 %v2764_v24  ;;  %2544 = vmatprep.subr.bf16.mxu1 %v2766_v25  ;;  %v3184_v9 = vld [vmem:[%s3046_s6 + $0x20] sm:$0xff]  ;;  %v2803_v10 = vld [vmem:[%s3614_s2 + $0x22c] ss:$12 sps:$4 sm:$0xff]   ;;  %v2815_v18 = vld [vmem:[%s3614_s2 + $0x1fc] ss:$12 sps:$4 sm:$0xff]  }
  0x24   : > { %v276_v13 = vunpack.c.l.s8.bf16 %v3184_v9  ;;  %v2809_v14 = vld [vmem:[%s3614_s2 + $0x214] ss:$12 sps:$4 sm:$0xff]   ;;  %v3208_v17 = vld [vmem:[%s3046_s6 + $0x38] sm:$0xff]  ;;  %v278_v20 = vunpack.c.h.s8.bf16 %v3184_v9  ;;  %v2821_v21 = vld [vmem:[%s3614_s2 + $0x1e4] ss:$12 sps:$4 sm:$0xff]  }
  0x25   : > { %v2813_v19 = vld [vmem:[%s3614_s2 + $0x1f8] ss:$12 sps:$4 sm:$0xff]   ;;  %v281_v22 = vunpack.c.l.s8.bf16 %v3208_v17  ;;  %v3224_v23 = vld [vmem:[%s3046_s6 + $0x30] sm:$0xff]  ;;  %v2819_v24 = vld [vmem:[%s3614_s2 + $0x1e0] ss:$12 sps:$4 sm:$0xff]  }
  0x26   : > { %617 = vmatpush1.bf16.msra.mxu0 %v2767_v26  ;;  %2545 = vmatpush3.bf16.msra.mxu1 %v2768_v27  ;;  %v2827_v25 = vld [vmem:[%s3614_s2 + $0x1cc] ss:$12 sps:$4 sm:$0xff]   ;;  %v280_v26 = vunpack.c.l.s8.bf16 %v3224_v23  ;;  %v283_v27 = vunpack.c.h.s8.bf16 %v3208_v17  ;;  %v2831_v30 = vld [vmem:[%s3614_s2 + $0x1b0] ss:$12 sps:$4 sm:$0xff]   ;;  %v282_v31 = vunpack.c.h.s8.bf16 %v3224_v23  ;;  %v2863_v52 = vld [vmem:[%s3614_s2 + $0xf4] ss:$12 sps:$4 sm:$0xff]  }
  0x27   : > { %618 = vmatprep.subr.bf16.mxu0 %v2769_v28  ;;  %2546 = vmatprep.subr.bf16.mxu1 %v2771_v29  ;;  %v2825_v28 = vld [vmem:[%s3614_s2 + $0x1c8] ss:$12 sps:$4 sm:$0xff]   ;;  %v2837_v35 = vld [vmem:[%s3614_s2 + $0x198] ss:$12 sps:$4 sm:$0xff]   ;;  %v2849_v42 = vld [vmem:[%s3614_s2 + $0x150] ss:$12 sps:$4 sm:$0xff]  }
  0x28   : > { %v2833_v29 = vld [vmem:[%s3614_s2 + $0x1b4] ss:$12 sps:$4 sm:$0xff]  }
  0x2a   : > { %619 = vmatpush1.bf16.msra.mxu0 %v2772_v32  ;;  %2547 = vmatpush3.bf16.msra.mxu1 %v2773_v33  ;;  %v2834_v32 = vld [vmem:[%s3614_s2 + $0x18] ss:$12 sps:$4 sm:$0xff]   ;;  %v2836_v33 = vld [vmem:[%s3614_s2 + $0x1c] ss:$12 sps:$4 sm:$0xff]  }
  0x2b   : > { %620 = vmatprep.subr.bf16.mxu0 %v2774_v34  ;;  %1586 = vmatprep.subr.bf16.mxu1 %v2800_v47  ;;  %v2839_v34 = vld [vmem:[%s3614_s2 + $0x19c] ss:$12 sps:$4 sm:$0xff]   ;;  %v2857_v47 = vld [vmem:[%s3614_s2 + $0x124] ss:$12 sps:$4 sm:$0xff]  }
  0x2d   : > { %750 = vmatmul.mubr.bf16.vlgmr.msra.gmra.mxu1 %v268_v36 }
  0x2e   : > { %621 = vmatpush2.bf16.msra.mxu0 %v2776_v37  ;;  %757 = vmatprep.mubr.bf16.mxu1 %v271_v38  ;;  %v2842_v37 = vld [vmem:[%s3614_s2 + $0x4] ss:$12 sps:$4 sm:$0xff]  }
  0x2f   : > { %622 = vmatprep.subr.bf16.mxu0 %v2777_v39  ;;  %1587 = vmatpush1.bf16.msra.mxu1 %v2798_v48  ;;  %v2843_v39 = vld [vmem:[%s3614_s2 + $0x180] ss:$12 sps:$4 sm:$0xff]   ;;  %v2918_v48 = vmov 0  }
  0x30   : > { %1588 = vmatprep.subr.bf16.mxu1 %v2806_v50  ;;  %v2858_v50 = vld [vmem:[%s3614_s2 + $0x108] ss:$12 sps:$4 sm:$0xff]  }
  0x32   : > { %623 = vmatpush2.bf16.msra.mxu0 %v2779_v40  ;;  %v2848_v40 = vld [vmem:[%s3614_s2 + $0x16c] ss:$12 sps:$4 sm:$0xff]  }
  0x33   : > { %624 = vmatprep.subr.bf16.mxu0 %v2780_v41  ;;  %1589 = vmatpush1.bf16.msra.mxu1 %v2804_v53  ;;  %v2846_v41 = vld [vmem:[%s3614_s2 + $0x168] ss:$12 sps:$4 sm:$0xff]  }
  0x34   : > { %1590 = vmatprep.subr.bf16.mxu1 %v2812_v54  ;;  %v2866_v53 = vld [vmem:[%s3614_s2 + $0xdc] ss:$12 sps:$4 sm:$0xff]   ;;  %v2864_v54 = vld [vmem:[%s3614_s2 + $0xd8] ss:$12 sps:$4 sm:$0xff]  }
  0x35   : > { %758 = vmatmul.mubr.bf16.gmra.mxu1 %v270_v44 }
  0x36   : > { %625 = vmatpush2.bf16.msra.mxu0 %v2782_v43  ;;  %765 = vmatprep.mubr.bf16.mxu1 %v273_v46  ;;  %v2851_v43 = vld [vmem:[%s3614_s2 + $0x154] ss:$12 sps:$4 sm:$0xff]  }
  0x37   : > { %626 = vmatprep.subr.bf16.mxu0 %v2783_v45  ;;  %1591 = vmatpush1.bf16.msra.mxu1 %v2810_v59  ;;  %v2852_v45 = vld [vmem:[%s3614_s2 + $0x138] ss:$12 sps:$4 sm:$0xff]  }
  0x38   : > { %1592 = vmatprep.subr.bf16.mxu1 %v2818_v60 }
  0x3a   : > { %627 = vmatpush2.bf16.msra.mxu0 %v2785_v49  ;;  %v2860_v49 = vld [vmem:[%s3614_s2 + $0x10c] ss:$12 sps:$4 sm:$0xff]  }
  0x3b   : > { %628 = vmatprep.subr.bf16.mxu0 %v2786_v51  ;;  %1593 = vmatpush1.bf16.msra.mxu1 %v2816_v1  ;;  %v2861_v51 = vld [vmem:[%s3614_s2 + $0xf0] ss:$12 sps:$4 sm:$0xff]  }
  0x3c   : > { %1594 = vmatprep.subr.bf16.mxu1 %v2824_v3  ;;  %v2873_v3 = vld [vmem:[%s3614_s2 + $0x218] ss:$12 sps:$4 sm:$0xff]  }
  0x3d   : > { %766 = vmatmul.mubr.bf16.gmra.mxu1 %v272_v55 }
  0x3e   : > { %629 = vmatpush2.bf16.msra.mxu0 %v2788_v56  ;;  %773 = vmatprep.mubr.bf16.mxu1 %v275_v58  ;;  %v2869_v56 = vld [vmem:[%s3614_s2 + $0xc4] ss:$12 sps:$4 sm:$0xff]  }
  0x3f   : > { %630 = vmatprep.subr.bf16.mxu0 %v2789_v57  ;;  %1595 = vmatpush1.bf16.msra.mxu1 %v2822_v5  ;;  %v2870_v57 = vld [vmem:[%s3614_s2 + $0x170] ss:$12 sps:$4 sm:$0xff]  }
  0x40   : > { %1596 = vmatprep.subr.bf16.mxu1 %v2830_v7  ;;  %v2876_v7 = vld [vmem:[%s3614_s2 + $0x200] ss:$12 sps:$4 sm:$0xff]  }
  0x42   : > { %631 = vmatpush2.bf16.msra.mxu0 %v2791_v61 }
  0x43   : > { %632 = vmatprep.subr.bf16.mxu0 %v2792_v62  ;;  %1597 = vmatpush1.bf16.msra.mxu1 %v2828_v11 }
  0x44   : > { %1598 = vmatprep.subr.bf16.mxu1 %v2836_v33 }
  0x45   : > { %774 = vmatmul.mubr.bf16.gmra.mxu1 %v274_v4 }
  0x46   : > { %633 = vmatpush2.bf16.msra.mxu0 %v2794_v63  ;;  %781 = vmatprep.mubr.bf16.mxu1 %v277_v6 }
  0x47   : > { %634 = vmatprep.subr.bf16.mxu0 %v2795_v2  ;;  %1599 = vmatpush1.bf16.msra.mxu1 %v2834_v32  ;;  %v2885_v32 = vld [vmem:[%s3614_s2 + $0x188] ss:$12 sps:$4 sm:$0xff]  }
  0x48   : > { %1600 = vmatprep.subr.bf16.mxu1 %v2842_v37 }
  0x4a   : > { %635 = vmatpush2.bf16.msra.mxu0 %v2797_v8 }
  0x4b   : > { %1699 = vmatprep.subr.bf16.mxu0 %v2803_v10 }
  0x4d   : > { %637 = vmatmul.mubr.bf16.vlgmr.msra.gmra.mxu0 %v268_v36  ;;  %782 = vmatmul.mubr.bf16.gmra.mxu1 %v276_v13  ;;  %v2840_v36 = vld [vmem:[%s3614_s2] ss:$12 sps:$4 sm:$0xff]  }
  0x4e   : > { %646 = vmatprep.mubr.bf16.mxu0 %v271_v38  ;;  %789 = vmatprep.mubr.bf16.mxu1 %v279_v15  ;;  %v2845_v38 = vld [vmem:[%s3614_s2 + $0x184] ss:$12 sps:$4 sm:$0xff]  }
  0x4f   : > { %1700 = vmatpush1.bf16.msra.mxu0 %v2801_v12  ;;  %1601 = vmatpush1.bf16.msra.mxu1 %v2840_v36  ;;  %v2877_v12 = vld [vmem:[%s3614_s2 + $0x1e8] ss:$12 sps:$4 sm:$0xff]  }
  0x50   : > { %1701 = vmatprep.subr.bf16.mxu0 %v2809_v14  ;;  %1602 = vmatprep.subr.bf16.mxu1 %v2848_v40  ;;  %v2871_v40 = vld [vmem:[%s3614_s2 + $0xb0] ss:$12 sps:$4 sm:$0xff]  }
  0x53   : > { %1702 = vmatpush1.bf16.msra.mxu0 %v2807_v16  ;;  %1603 = vmatpush2.bf16.msra.mxu1 %v2846_v41  ;;  %v2880_v16 = vld [vmem:[%s3614_s2 + $0x1d0] ss:$12 sps:$4 sm:$0xff]  }
  0x54   : > { %1703 = vmatprep.subr.bf16.mxu0 %v2815_v18  ;;  %1604 = vmatprep.subr.bf16.mxu1 %v2851_v43 }
  0x55   : > { %647 = vmatmul.mubr.bf16.gmra.mxu0 %v270_v44  ;;  %790 = vmatmul.mubr.bf16.gmra.mxu1 %v278_v20  ;;  %v2854_v44 = vld [vmem:[%s3614_s2 + $0x13c] ss:$12 sps:$4 sm:$0xff]  }
  0x56   : > { %656 = vmatprep.mubr.bf16.mxu0 %v273_v46  ;;  %797 = vmatprep.mubr.bf16.mxu1 %v281_v22  ;;  %v2855_v46 = vld [vmem:[%s3614_s2 + $0x120] ss:$12 sps:$4 sm:$0xff]  }
  0x57   : > { %1704 = vmatpush1.bf16.msra.mxu0 %v2813_v19  ;;  %1605 = vmatpush2.bf16.msra.mxu1 %v2849_v42 }
  0x58   : > { %1705 = vmatprep.subr.bf16.mxu0 %v2821_v21  ;;  %1606 = vmatprep.subr.bf16.mxu1 %v2854_v44  ;;  %v2881_v21 = vld [vmem:[%s3614_s2 + $0x1b8] ss:$12 sps:$4 sm:$0xff]  }
  0x59   : > { %v2874_v44 = vld [vmem:[%s3614_s2 + $0x158] ss:$12 sps:$4 sm:$0xff]  }
  0x5b   : > { %1706 = vmatpush1.bf16.msra.mxu0 %v2819_v24  ;;  %1607 = vmatpush2.bf16.msra.mxu1 %v2852_v45 }
  0x5c   : > { %1707 = vmatprep.subr.bf16.mxu0 %v2827_v25  ;;  %1608 = vmatprep.subr.bf16.mxu1 %v2857_v47  ;;  %v2884_v25 = vld [vmem:[%s3614_s2 + $0x1a0] ss:$12 sps:$4 sm:$0xff]  }
  0x5d   : > { %657 = vmatmul.mubr.bf16.gmra.mxu0 %v272_v55  ;;  %798 = vmatmul.mubr.bf16.gmra.mxu1 %v280_v26  ;;  %v2867_v55 = vld [vmem:[%s3614_s2 + $0xc0] ss:$12 sps:$4 sm:$0xff]  }
  0x5e   : > { %666 = vmatprep.mubr.bf16.mxu0 %v275_v58  ;;  %805 = vmatprep.mubr.bf16.mxu1 %v283_v27  ;;  %v2872_v58 = vld [vmem:[%s3614_s2 + $0x230] ss:$12 sps:$4 sm:$0xff]  }
  0x5f   : > { %1708 = vmatpush1.bf16.msra.mxu0 %v2825_v28  ;;  %1609 = vmatpush2.bf16.msra.mxu1 %v2855_v46 }
  0x60   : > { %1709 = vmatprep.subr.bf16.mxu0 %v2833_v29  ;;  %1610 = vmatprep.subr.bf16.mxu1 %v2860_v49 }
  0x63   : > { %1710 = vmatpush1.bf16.msra.mxu0 %v2831_v30  ;;  %1611 = vmatpush2.bf16.msra.mxu1 %v2858_v50  ;;  %v2875_v50 = vld [vmem:[%s3614_s2 + $0x98] ss:$12 sps:$4 sm:$0xff]  }
  0x64   : > { %1711 = vmatprep.subr.bf16.mxu0 %v2839_v34  ;;  %1612 = vmatprep.subr.bf16.mxu1 %v2863_v52  ;;  %v2878_v52 = vld [vmem:[%s3614_s2 + $0x140] ss:$12 sps:$4 sm:$0xff]  }
  0x65   : > { %667 = vmatmul.mubr.bf16.gmra.mxu0 %v274_v4  ;;  %806 = vmatmul.mubr.bf16.gmra.mxu1 %v282_v31 }
  0x66   : > { %676 = vmatprep.mubr.bf16.mxu0 %v277_v6 }
  0x67   : > { %1712 = vmatpush1.bf16.msra.mxu0 %v2837_v35  ;;  %1613 = vmatpush2.bf16.msra.mxu1 %v2861_v51 }
  0x68   : > { %1713 = vmatprep.subr.bf16.mxu0 %v2845_v38  ;;  %1614 = vmatprep.subr.bf16.mxu1 %v2866_v53 }
  0x6b   : > { %1714 = vmatpush1.bf16.msra.mxu0 %v2843_v39  ;;  %1615 = vmatpush2.bf16.msra.mxu1 %v2864_v54 }
  0x6c   : > { %1616 = vmatprep.subr.bf16.mxu1 %v2869_v56  ;;  %2676 = vmatprep.subr.bf16.mxu0 %v2872_v58 }
  0x6d   : > { %677 = vmatmul.mubr.bf16.gmra.mxu0 %v276_v13 }
  0x6e   : > { %686 = vmatprep.mubr.bf16.mxu0 %v279_v15 }
  0x6f   : > { %1617 = vmatpush2.bf16.msra.mxu1 %v2867_v55 }
  0x70   : > { %2596 = vmatprep.subr.bf16.mxu1 %v2870_v57 }
  0x75   : > { %687 = vmatmul.mubr.bf16.gmra.mxu0 %v278_v20 }
  0x76   : > { %696 = vmatprep.mubr.bf16.mxu0 %v281_v22 }
  0x7d   : > { %697 = vmatmul.mubr.bf16.gmra.mxu0 %v280_v26 }
  0x7e   : > { %706 = vmatprep.mubr.bf16.mxu0 %v283_v27 }
  0x85   : > { %707 = vmatmul.mubr.bf16.gmra.mxu0 %v282_v31 }
  0x86   : > { %1731 = vmatprep.mubr.bf16.mxu0 %v2918_v48 }
  0xed   : > { %v2548_v59 = vpop.f32.mrf.mxu1 }
  0xef   : > { %v2549_v60 = vpop.f32.mrf.mxu1 }
  0xf0   : > { %v2550_v62 = vadd.f32 %v2549_v60, %v2548_v59 }
  0xf1   : > { %v2551_v61 = vpop.f32.mrf.mxu1 }
  0xf3   : > { %v2552_v63 = vpop.f32.mrf.mxu1 }
  0xf4   : > { %v2553_v0 = vadd.f32 %v2552_v63, %v2551_v61 }
  0xf5   : > { %v2554_v1 = vpop.f32.mrf.mxu1 }
  0xf6   : > { %v3329_v2 = vpack.c.bf16 %v2553_v0, %v2550_v62  ;;  %v2882_v62 = vld [vmem:[%s3614_s2 + $0x128] ss:$12 sps:$4 sm:$0xff]  }
  0xf7   : > { %v2555_v4 = vpop.f32.mrf.mxu1 }
  0xf8   : > { %1732 = vmatmul.mubr.bf16.vlgmr.msra.gmra.mxu0 %v3329_v2  ;;  %v2556_v6 = vadd.f32 %v2555_v4, %v2554_v1  ;;  %v2883_v4 = vld [vmem:[%s3614_s2 + $0x68] ss:$12 sps:$4 sm:$0xff]  }
  0xf9   : > { %v2557_v5 = vpop.f32.mrf.mxu1  ;;  %1741 = vmatprep.mubr.bf16.mxu0 %v2918_v48  ;;  %2677 = vmatpush3.bf16.msra.mxu0 %v2872_v58  ;;  %v2879_v58 = vld [vmem:[%s3614_s2 + $0x80] ss:$12 sps:$4 sm:$0xff]  }
  0xfa   : > { %2678 = vmatprep.subr.bf16.mxu0 %v2873_v3 }
  0xfb   : > { %v2558_v8 = vpop.f32.mrf.mxu1 }
  0xfc   : > { %v2559_v9 = vadd.f32 %v2558_v8, %v2557_v5 }
  0xfd   : > { %v2560_v10 = vpop.f32.mrf.mxu1  ;;  %2679 = vmatpush3.bf16.msra.mxu0 %v2873_v3 }
  0xfe   : > { %v3339_v11 = vpack.c.bf16 %v2559_v9, %v2556_v6  ;;  %2680 = vmatprep.subr.bf16.mxu0 %v2876_v7  ;;  %v2886_v6 = vld [vmem:[%s3614_s2 + $0x110] ss:$12 sps:$4 sm:$0xff]  }
  0xff   : > { %v2561_v13 = vpop.f32.mrf.mxu1 }
 0x100   : > { %1742 = vmatmul.mubr.bf16.gmra.mxu0 %v3339_v11  ;;  %v2562_v15 = vadd.f32 %v2561_v13, %v2560_v10  ;;  %v2887_v13 = vld [vmem:[%s3614_s2 + $0x50] ss:$12 sps:$4 sm:$0xff]  }
 0x101   : > { %v2563_v14 = vpop.f32.mrf.mxu1  ;;  %1751 = vmatprep.mubr.bf16.mxu0 %v2918_v48  ;;  %2681 = vmatpush3.bf16.msra.mxu0 %v2876_v7 }
 0x102   : > { %2682 = vmatprep.subr.bf16.mxu0 %v2877_v12 }
 0x103   : > { %v2564_v17 = vpop.f32.mrf.mxu1 }
 0x104   : > { %v2565_v18 = vadd.f32 %v2564_v17, %v2563_v14  ;;  %v2888_v17 = vld [vmem:[%s3614_s2 + $0xf8] ss:$12 sps:$4 sm:$0xff]  }
 0x105   : > { %v2566_v19 = vpop.f32.mrf.mxu1  ;;  %2683 = vmatpush3.bf16.msra.mxu0 %v2877_v12 }
 0x106   : > { %v3349_v20 = vpack.c.bf16 %v2565_v18, %v2562_v15  ;;  %2684 = vmatprep.subr.bf16.mxu0 %v2880_v16 }
 0x107   : > { %v2567_v22 = vpop.f32.mrf.mxu1 }
 0x108   : > { %1752 = vmatmul.mubr.bf16.gmra.mxu0 %v3349_v20  ;;  %v2568_v24 = vadd.f32 %v2567_v22, %v2566_v19 }
 0x109   : > { %v2569_v23 = vpop.f32.mrf.mxu1  ;;  %1761 = vmatprep.mubr.bf16.mxu0 %v2918_v48  ;;  %2685 = vmatpush3.bf16.msra.mxu0 %v2880_v16 }
 0x10a   : > { %2686 = vmatprep.subr.bf16.mxu0 %v2881_v21 }
 0x10b   : > { %v2570_v26 = vpop.f32.mrf.mxu1 }
 0x10c   : > { %v2571_v27 = vadd.f32 %v2570_v26, %v2569_v23  ;;  %v2889_v23 = vld [vmem:[%s3614_s2 + $0x38] ss:$12 sps:$4 sm:$0xff]  }
 0x10d   : > { %v638_v28 = vpop.f32.mrf.mxu0  ;;  %v2572_v29 = vpop.f32.mrf.mxu1  ;;  %2687 = vmatpush3.bf16.msra.mxu0 %v2881_v21 }
 0x10e   : > { %v3359_v30 = vpack.c.bf16 %v2571_v27, %v2568_v24  ;;  %2688 = vmatprep.subr.bf16.mxu0 %v2884_v25 }
 0x10f   : > { %v640_v31 = vpop.f32.mrf.mxu0  ;;  %v2573_v33 = vpop.f32.mrf.mxu1 }
 0x110   : > { %1762 = vmatmul.mubr.bf16.gmra.mxu0 %v3359_v30  ;;  %v2574_v36 = vadd.f32 %v2573_v33, %v2572_v29 }
 0x111   : > { %v642_v34 = vpop.f32.mrf.mxu0  ;;  %v2575_v35 = vpop.f32.mrf.mxu1  ;;  %1771 = vmatprep.mubr.bf16.mxu0 %v2918_v48  ;;  %2689 = vmatpush3.bf16.msra.mxu0 %v2884_v25  ;;  %v2890_v25 = vld [vmem:[%s3614_s2 + $0xe0] ss:$12 sps:$4 sm:$0xff]  }
 0x112   : > { %2690 = vmatprep.subr.bf16.mxu0 %v2885_v32  ;;  %v3371_v41 = vpack.c.bf16 %v642_v34, %v638_v28 }
 0x113   : > { %v644_v37 = vpop.f32.mrf.mxu0  ;;  %v2576_v39 = vpop.f32.mrf.mxu1 }
 0x114   : > { %v3366_v38 = vpack.c.bf16 %v644_v37, %v640_v31  ;;  %v2577_v42 = vadd.f32 %v2576_v39, %v2575_v35  ;;  %v2893_v39 = vld [vmem:[%s3614_s2 + $0x8] ss:$12 sps:$4 sm:$0xff]  }
 0x115   : > { %v648_v43 = vpop.f32.mrf.mxu0  ;;  %v2578_v45 = vpop.f32.mrf.mxu1  ;;  %2691 = vmatpush3.bf16.msra.mxu0 %v2885_v32  ;;  %v2891_v32 = vld [vmem:[%s3614_s2 + $0x20] ss:$12 sps:$4 sm:$0xff]  }
 0x116   : > { %1618 = vmatprep.mubr.bf16.mxu1 %v3366_v38  ;;  %v3377_v46 = vpack.c.bf16 %v2577_v42, %v2574_v36  ;;  %v2892_v36 = vld [vmem:[%s3614_s2 + $0xc8] ss:$12 sps:$4 sm:$0xff]  }
 0x117   : > { %v650_v47 = vpop.f32.mrf.mxu0  ;;  %1619 = vmatmul.mubr.bf16.vlgmr.msra.gmra.mxu1 %v3371_v41  ;;  %v2579_v49 = vpop.f32.mrf.mxu1 }
 0x118   : > { %2597 = vmatpush3.bf16.msra.mxu1 %v2871_v40  ;;  %1772 = vmatmul.mubr.bf16.gmra.mxu0 %v3377_v46  ;;  %v2580_v54 = vadd.f32 %v2579_v49, %v2578_v45 }
 0x119   : > { %v652_v51 = vpop.f32.mrf.mxu0  ;;  %2598 = vmatprep.subr.bf16.mxu1 %v2874_v44  ;;  %v2581_v53 = vpop.f32.mrf.mxu1  ;;  %1781 = vmatprep.mubr.bf16.mxu0 %v2918_v48 }
 0x11a   : > { %v3393_v59 = vpack.c.bf16 %v652_v51, %v648_v43 }
 0x11b   : > { %v654_v55 = vpop.f32.mrf.mxu0  ;;  %v2582_v57 = vpop.f32.mrf.mxu1 }
 0x11c   : > { %v3388_v56 = vpack.c.bf16 %v654_v55, %v650_v47  ;;  %2599 = vmatpush3.bf16.msra.mxu1 %v2875_v50  ;;  %v2583_v60 = vadd.f32 %v2582_v57, %v2581_v53 }
 0x11d   : > { %v658_v61 = vpop.f32.mrf.mxu0  ;;  %2600 = vmatprep.subr.bf16.mxu1 %v2878_v52  ;;  %v2584_v63 = vpop.f32.mrf.mxu1 }
 0x11e   : > { %1628 = vmatprep.mubr.bf16.mxu1 %v3388_v56  ;;  %v3399_v0 = vpack.c.bf16 %v2583_v60, %v2580_v54 }
 0x11f   : > { %v660_v1 = vpop.f32.mrf.mxu0  ;;  %1629 = vmatmul.mubr.bf16.gmra.mxu1 %v3393_v59  ;;  %v2585_v3 = vpop.f32.mrf.mxu1 }
 0x120   : > { %2601 = vmatpush3.bf16.msra.mxu1 %v2879_v58  ;;  %1782 = vmatmul.mubr.bf16.gmra.mxu0 %v3399_v0  ;;  %v2586_v8 = vadd.f32 %v2585_v3, %v2584_v63  ;;  %v1187_v3 = vlaneseq }
 0x121   : > { %v662_v5 = vpop.f32.mrf.mxu0  ;;  %2602 = vmatprep.subr.bf16.mxu1 %v2882_v62  ;;  %v2587_v7 = vpop.f32.mrf.mxu1  ;;  %1791 = vmatprep.mubr.bf16.mxu0 %v2918_v48 }
 0x122   : > { %v3415_v14 = vpack.c.bf16 %v662_v5, %v658_v61 }
 0x123   : > { %v664_v9 = vpop.f32.mrf.mxu0  ;;  %v2588_v12 = vpop.f32.mrf.mxu1 }
 0x124   : > { %v3410_v10 = vpack.c.bf16 %v664_v9, %v660_v1  ;;  %2603 = vmatpush3.bf16.msra.mxu1 %v2883_v4  ;;  %v2589_v15 = vadd.f32 %v2588_v12, %v2587_v7  ;;  %v3467_v12 = vld [vmem:[%s3615_s3] sm:$0x7] }
 0x125   : > { %v668_v16 = vpop.f32.mrf.mxu0  ;;  %2604 = vmatprep.subr.bf16.mxu1 %v2886_v6  ;;  %v2590_v18 = vpop.f32.mrf.mxu1  ;;  %v3454_v6 = vshrl.u32 %v1187_v3, 7 }
 0x126   : > { %1638 = vmatprep.mubr.bf16.mxu1 %v3410_v10  ;;  %v1085_v19 = vpack.c.bf16 %v2589_v15, %v2586_v8 }
 0x127   : > { %v670_v21 = vpop.f32.mrf.mxu0  ;;  %1639 = vmatmul.mubr.bf16.gmra.mxu1 %v3415_v14  ;;  %v2591_v22 = vpop.f32.mrf.mxu1  ;;  %v1189_v9 = vsub.s32 0, %v3454_v6 }
 0x128   : > { %2605 = vmatpush3.bf16.msra.mxu1 %v2887_v13  ;;  %1792 = vmatmul.mubr.bf16.gmra.mxu0 %v1085_v19  ;;  %v2592_v27 = vadd.f32 %v2591_v22, %v2590_v18  ;;  %v1193_v13 = vsub.s32 1, %v3454_v6 }
 0x129   : > { %v672_v24 = vpop.f32.mrf.mxu0  ;;  %2606 = vmatprep.subr.bf16.mxu1 %v2888_v17  ;;  %v2593_v26 = vpop.f32.mrf.mxu1  ;;  %1801 = vmatprep.mubr.bf16.mxu0 %v2918_v48  ;;  %v3473_v15 = vrot.slane %v3467_v12, %v1189_v9 }
 0x12a   : > { %v1074_v33 = vpack.c.bf16 %v672_v24, %v668_v16  ;;  %v3478_v17 = vrot.slane %v3467_v12, %v1193_v13 }
 0x12b   : > { %v674_v28 = vpop.f32.mrf.mxu0  ;;  %v2594_v31 = vpop.f32.mrf.mxu1 }
 0x12c   : > { %v1075_v29 = vpack.c.bf16 %v674_v28, %v670_v21  ;;  %2607 = vmatpush3.bf16.msra.mxu1 %v2889_v23  ;;  %v2595_v34 = vadd.f32 %v2594_v31, %v2593_v26 }
 0x12d   : > { %v678_v35 = vpop.f32.mrf.mxu0  ;;  %2608 = vmatprep.subr.bf16.mxu1 %v2890_v25 }
 0x12e   : > { %1648 = vmatprep.mubr.bf16.mxu1 %v1075_v29  ;;  %v1088_v37 = vpack.c.bf16 %v2595_v34, %v2592_v27 }
 0x12f   : > { %v680_v48 = vpop.f32.mrf.mxu0  ;;  %1649 = vmatmul.mubr.bf16.gmra.mxu1 %v1074_v33 }
 0x130   : > { %2609 = vmatpush3.bf16.msra.mxu1 %v2891_v32  ;;  %1802 = vmatmul.mubr.bf16.gmra.mxu0 %v1088_v37 }
 0x131   : > { %v682_v40 = vpop.f32.mrf.mxu0  ;;  %2610 = vmatprep.subr.bf16.mxu1 %v2892_v36  ;;  %2692 = vmatprep.mubr.bf16.mxu0 %v3329_v2 }
 0x132   : > { %v1077_v44 = vpack.c.bf16 %v682_v40, %v678_v35 }
 0x133   : > { %v684_v42 = vpop.f32.mrf.mxu0 }
 0x134   : > { %v1078_v43 = vpack.c.bf16 %v684_v42, %v680_v48  ;;  %2611 = vmatpush3.bf16.msra.mxu1 %v2893_v39 }
 0x135   : > { %v688_v45 = vpop.f32.mrf.mxu0 }
 0x136   : > { %1658 = vmatprep.mubr.bf16.mxu1 %v1078_v43 }
 0x137   : > { %v690_v47 = vpop.f32.mrf.mxu0  ;;  %1659 = vmatmul.mubr.bf16.gmra.mxu1 %v1077_v44 }
 0x138   : > { %2693 = vmatmul.mubr.bf16.vlgmr.msra.gmra.mxu0 %v3339_v11 }
 0x139   : > { %v692_v49 = vpop.f32.mrf.mxu0  ;;  %2696 = vmatprep.mubr.bf16.mxu0 %v3349_v20 }
 0x13a   : > { %v1080_v52 = vpack.c.bf16 %v692_v49, %v688_v45 }
 0x13b   : > { %v694_v50 = vpop.f32.mrf.mxu0 }
 0x13c   : > { %v1081_v51 = vpack.c.bf16 %v694_v50, %v690_v47 }
 0x13d   : > { %v698_v53 = vpop.f32.mrf.mxu0 }
 0x13e   : > { %1668 = vmatprep.mubr.bf16.mxu1 %v1081_v51 }
 0x13f   : > { %v700_v54 = vpop.f32.mrf.mxu0  ;;  %1669 = vmatmul.mubr.bf16.gmra.mxu1 %v1080_v52 }
 0x140   : > { %2697 = vmatmul.mubr.bf16.gmra.mxu0 %v3359_v30 }
 0x141   : > { %v702_v2 = vpop.f32.mrf.mxu0  ;;  %2700 = vmatprep.mubr.bf16.mxu0 %v3377_v46 }
 0x142   : > { %v1083_v58 = vpack.c.bf16 %v702_v2, %v698_v53 }
 0x143   : > { %v704_v55 = vpop.f32.mrf.mxu0 }
 0x144   : > { %v1084_v57 = vpack.c.bf16 %v704_v55, %v700_v54 }
 0x145   : > { %v708_v60 = vpop.f32.mrf.mxu0 }
 0x146   : > { %1678 = vmatprep.mubr.bf16.mxu1 %v1084_v57 }
 0x147   : > { %v710_v11 = vpop.f32.mrf.mxu0  ;;  %1679 = vmatmul.mubr.bf16.gmra.mxu1 %v1083_v58 }
 0x148   : > { %2701 = vmatmul.mubr.bf16.gmra.mxu0 %v3399_v0 }
 0x149   : > { %v712_v20 = vpop.f32.mrf.mxu0  ;;  %2704 = vmatprep.mubr.bf16.mxu0 %v1085_v19 }
 0x14a   : > { %v1086_v63 = vpack.c.bf16 %v712_v20, %v708_v60 }
 0x14b   : > { %v714_v61 = vpop.f32.mrf.mxu0 }
 0x14c   : > { %v1087_v62 = vpack.c.bf16 %v714_v61, %v710_v11 }
 0x14e   : > { %1688 = vmatprep.mubr.bf16.mxu1 %v1087_v62 }
 0x14f   : > { %1689 = vmatmul.mubr.bf16.gmra.mxu1 %v1086_v63 }
 0x150   : > { %1844 = vmatprep.mubr.bf16.mxu1 %v3366_v38  ;;  %2705 = vmatmul.mubr.bf16.gmra.mxu0 %v1088_v37 }
 0x157   : > { %1845 = vmatmul.mubr.bf16.vlgmr.msra.gmra.mxu1 %v3371_v41 }
 0x158   : > { %1852 = vmatprep.mubr.bf16.mxu1 %v3388_v56 }
 0x15f   : > { %1853 = vmatmul.mubr.bf16.gmra.mxu1 %v3393_v59 }
 0x160   : > { %1860 = vmatprep.mubr.bf16.mxu1 %v3410_v10 }
 0x167   : > { %1861 = vmatmul.mubr.bf16.gmra.mxu1 %v3415_v14 }
 0x168   : > { %1868 = vmatprep.mubr.bf16.mxu1 %v1075_v29 }
 0x16f   : > { %1869 = vmatmul.mubr.bf16.gmra.mxu1 %v1074_v33 }
 0x170   : > { %1876 = vmatprep.mubr.bf16.mxu1 %v1078_v43 }
 0x177   : > { %1877 = vmatmul.mubr.bf16.gmra.mxu1 %v1077_v44 }
 0x178   : > { %1884 = vmatprep.mubr.bf16.mxu1 %v1081_v51 }
 0x17f   : > { %1885 = vmatmul.mubr.bf16.gmra.mxu1 %v1080_v52 }
 0x180   : > { %1892 = vmatprep.mubr.bf16.mxu1 %v1084_v57 }
 0x187   : > { %1893 = vmatmul.mubr.bf16.gmra.mxu1 %v1083_v58 }
 0x188   : > { %1900 = vmatprep.mubr.bf16.mxu1 %v1087_v62 }
 0x18f   : > { %1901 = vmatmul.mubr.bf16.gmra.mxu1 %v1086_v63 }
 0x1b8   : > { %v1733_v30 = vpop.f32.mrf.mxu0 }
 0x1ba   : > { %v1735_v38 = vpop.f32.mrf.mxu0 }
 0x1bc   : > { %v1737_v41 = vpop.f32.mrf.mxu0 }
 0x1be   : > { %v1739_v46 = vpop.f32.mrf.mxu0 }
 0x1c0   : > { %v1743_v56 = vpop.f32.mrf.mxu0 }
 0x1c2   : > { %v1745_v59 = vpop.f32.mrf.mxu0 }
 0x1c4   : > { %v1747_v0 = vpop.f32.mrf.mxu0 }
 0x1c6   : > { %v1749_v1 = vpop.f32.mrf.mxu0 }
 0x1c8   : > { %v3450_v4 = vpop.f32.mrf.mxu0 }
 0x1ca   : > { %v3452_v5 = vpop.f32.mrf.mxu0 }
 0x1cc   : > { %v3456_v7 = vpop.f32.mrf.mxu0 }
 0x1ce   : > { %v3458_v8 = vpop.f32.mrf.mxu0 }
 0x1d0   : > { %v3462_v10 = vpop.f32.mrf.mxu0 }
 0x1d2   : > { %v3470_v14 = vpop.f32.mrf.mxu0 }
 0x1d4   : > { %v3475_v16 = vpop.f32.mrf.mxu0 }
 0x1d6   : > { %v3480_v18 = vpop.f32.mrf.mxu0 }
 0x1d7   : > { %v1620_v19 = vpop.f32.mrf.mxu1 }
 0x1d8   : > { %v1621_v21 = vadd.f32 %v1620_v19, %v3473_v15  ;;  %v3483_v22 = vpop.f32.mrf.mxu0 }
 0x1d9   : > { %v1622_v23 = vpop.f32.mrf.mxu1 }
 0x1da   : > { %v1734_v24 = vadd.f32 %v1733_v30, %v1621_v21  ;;  %v1623_v25 = vadd.f32 %v1622_v23, %v3478_v17  ;;  %v3486_v26 = vpop.f32.mrf.mxu0 }
 0x1db   : > { %v1624_v27 = vpop.f32.mrf.mxu1 }
 0x1dc   : > { %v1736_v28 = vadd.f32 %v1735_v38, %v1623_v25  ;;  %v1625_v29 = vadd.f32 %v1624_v27, %v3473_v15  ;;  %v3489_v31 = vpop.f32.mrf.mxu0  ;;  %v2006_v33 = vmax.f32 %v1734_v24, 0.0 }
 0x1dd   : > { %v1626_v32 = vpop.f32.mrf.mxu1 }
 0x1de   : > { %v2007_v34 = vmax.f32 %v1736_v28, 0.0  ;;  %v1738_v35 = vadd.f32 %v1737_v41, %v1625_v29  ;;  %v1627_v36 = vadd.f32 %v1626_v32, %v3478_v17  ;;  %v3498_v42 = vpop.f32.mrf.mxu0 }
 0x1df   : > { %v1630_v37 = vpop.f32.mrf.mxu1 }
 0x1e0   : > { %v2500_v48 = vpack.c.bf16 %v2007_v34, %v2006_v33  ;;  %v1740_v39 = vadd.f32 %v1739_v46, %v1627_v36  ;;  %v1631_v40 = vadd.f32 %v1630_v37, %v3473_v15  ;;  %v2009_v44 = vmax.f32 %v1738_v35, 0.0  ;;  %v3503_v54 = vpop.f32.mrf.mxu0 }
 0x1e1   : > { %v1632_v43 = vpop.f32.mrf.mxu1 }
 0x1e2   : > { %2214 = vst [vmem:[%s3495_s5] sm:$0xff] %v2500_v48  ;;  %v2010_v45 = vmax.f32 %v1740_v39, 0.0  ;;  %v1744_v47 = vadd.f32 %v1743_v56, %v1631_v40  ;;  %v1633_v49 = vadd.f32 %v1632_v43, %v3478_v17  ;;  %v3508_v63 = vpop.f32.mrf.mxu0 }
 0x1e3   : > { %v1634_v50 = vpop.f32.mrf.mxu1 }
 0x1e4   : > { %v2502_v51 = vpack.c.bf16 %v2010_v45, %v2009_v44  ;;  %v1746_v52 = vadd.f32 %v1745_v59, %v1633_v49  ;;  %v1635_v53 = vadd.f32 %v1634_v50, %v3473_v15  ;;  %v2012_v55 = vmax.f32 %v1744_v47, 0.0 }
 0x1e5   : > { %v1636_v2 = vpop.f32.mrf.mxu1 }
 0x1e6   : > { %2216 = vst [vmem:[%s3495_s5 + $0xc] sm:$0xff] %v2502_v51  ;;  %v2013_v57 = vmax.f32 %v1746_v52, 0.0  ;;  %v1748_v58 = vadd.f32 %v1747_v0, %v1635_v53  ;;  %v1637_v60 = vadd.f32 %v1636_v2, %v3478_v17 }
 0x1e7   : > { %v1640_v11 = vpop.f32.mrf.mxu1 }
 0x1e8   : > { %v2504_v20 = vpack.c.bf16 %v2013_v57, %v2012_v55  ;;  %v1750_v61 = vadd.f32 %v1749_v1, %v1637_v60  ;;  %v1641_v62 = vadd.f32 %v1640_v11, %v3473_v15  ;;  %v2015_v38 = vmax.f32 %v1748_v58, 0.0  ;;  %v3515_v1 = vpop.f32.mrf.mxu0 }
 0x1e9   : > { %v1642_v30 = vpop.f32.mrf.mxu1 }
 0x1ea   : > { %2218 = vst [vmem:[%s3495_s5 + $0x18] sm:$0xff] %v2504_v20  ;;  %v2016_v41 = vmax.f32 %v1750_v61, 0.0  ;;  %v1754_v46 = vadd.f32 %v3450_v4, %v1641_v62  ;;  %v1643_v56 = vadd.f32 %v1642_v30, %v3478_v17 }
 0x1eb   : > { %v1644_v59 = vpop.f32.mrf.mxu1 }
 0x1ec   : > { %v2506_v0 = vpack.c.bf16 %v2016_v41, %v2015_v38  ;;  %v1756_v3 = vadd.f32 %v3452_v5, %v1643_v56  ;;  %v1645_v9 = vadd.f32 %v1644_v59, %v3473_v15  ;;  %v2018_v19 = vmax.f32 %v1754_v46, 0.0  ;;  %v3522_v5 = vpop.f32.mrf.mxu0 }
 0x1ed   : > { %v1646_v13 = vpop.f32.mrf.mxu1 }
 0x1ee   : > { %2220 = vst [vmem:[%s3495_s5 + $0x24] sm:$0xff] %v2506_v0  ;;  %v2019_v21 = vmax.f32 %v1756_v3, 0.0  ;;  %v1758_v23 = vadd.f32 %v3456_v7, %v1645_v9  ;;  %v1647_v24 = vadd.f32 %v1646_v13, %v3478_v17 }
 0x1ef   : > { %v1650_v4 = vpop.f32.mrf.mxu1 }
 0x1f0   : > { %v2508_v25 = vpack.c.bf16 %v2019_v21, %v2018_v19  ;;  %v1760_v27 = vadd.f32 %v3458_v8, %v1647_v24  ;;  %v1651_v28 = vadd.f32 %v1650_v4, %v3473_v15  ;;  %v2021_v32 = vmax.f32 %v1758_v23, 0.0  ;;  %v1793_v8 = vpop.f32.mrf.mxu0 }
 0x1f1   : > { %v1652_v29 = vpop.f32.mrf.mxu1 }
 0x1f2   : > { %2222 = vst [vmem:[%s3495_s5 + $0x30] sm:$0xff] %v2508_v25  ;;  %v2022_v33 = vmax.f32 %v1760_v27, 0.0  ;;  %v1764_v34 = vadd.f32 %v3462_v10, %v1651_v28  ;;  %v1653_v35 = vadd.f32 %v1652_v29, %v3478_v17  ;;  %v1795_v51 = vpop.f32.mrf.mxu0 }
 0x1f3   : > { %v1654_v7 = vpop.f32.mrf.mxu1 }
 0x1f4   : > { %v2510_v36 = vpack.c.bf16 %v2022_v33, %v2021_v32  ;;  %v1766_v37 = vadd.f32 %v3470_v14, %v1653_v35  ;;  %v1655_v48 = vadd.f32 %v1654_v7, %v3473_v15  ;;  %v2024_v40 = vmax.f32 %v1764_v34, 0.0  ;;  %v1797_v11 = vpop.f32.mrf.mxu0 }
 0x1f5   : > { %v1656_v39 = vpop.f32.mrf.mxu1 }
 0x1f6   : > { %2224 = vst [vmem:[%s3495_s5 + $0x3c] sm:$0xff] %v2510_v36  ;;  %v2025_v43 = vmax.f32 %v1766_v37, 0.0  ;;  %v1768_v44 = vadd.f32 %v3475_v16, %v1655_v48  ;;  %v1657_v45 = vadd.f32 %v1656_v39, %v3478_v17  ;;  %v1799_v56 = vpop.f32.mrf.mxu0 }
 0x1f7   : > { %v1660_v47 = vpop.f32.mrf.mxu1 }
 0x1f8   : > { %v2512_v10 = vpack.c.bf16 %v2025_v43, %v2024_v40  ;;  %v1770_v49 = vadd.f32 %v3480_v18, %v1657_v45  ;;  %v1661_v50 = vadd.f32 %v1660_v47, %v3473_v15  ;;  %v2027_v52 = vmax.f32 %v1768_v44, 0.0  ;;  %v1803_v23 = vpop.f32.mrf.mxu0 }
 0x1f9   : > { %v1662_v14 = vpop.f32.mrf.mxu1 }
 0x1fa   : > { %2226 = vst [vmem:[%s3495_s5 + $0x48] sm:$0xff] %v2512_v10  ;;  %v2028_v53 = vmax.f32 %v1770_v49, 0.0  ;;  %v1774_v2 = vadd.f32 %v3483_v22, %v1661_v50  ;;  %v1663_v55 = vadd.f32 %v1662_v14, %v3478_v17  ;;  %v1805_v33 = vpop.f32.mrf.mxu0 }
 0x1fb   : > { %v1664_v57 = vpop.f32.mrf.mxu1 }
 0x1fc   : > { %v2514_v16 = vpack.c.bf16 %v2028_v53, %v2027_v52  ;;  %v1776_v58 = vadd.f32 %v3486_v26, %v1663_v55  ;;  %v1665_v60 = vadd.f32 %v1664_v57, %v3473_v15  ;;  %v2030_v20 = vmax.f32 %v1774_v2, 0.0  ;;  %v1807_v40 = vpop.f32.mrf.mxu0 }
 0x1fd   : > { %v1666_v18 = vpop.f32.mrf.mxu1 }
 0x1fe   : > { %2228 = vst [vmem:[%s3495_s5 + $0x54] sm:$0xff] %v2514_v16  ;;  %v2031_v61 = vmax.f32 %v1776_v58, 0.0  ;;  %v1778_v62 = vadd.f32 %v3489_v31, %v1665_v60  ;;  %v1667_v30 = vadd.f32 %v1666_v18, %v3478_v17  ;;  %v1809_v14 = vpop.f32.mrf.mxu0 }
 0x1ff   : > { %v1670_v38 = vpop.f32.mrf.mxu1 }
 0x200   : > { %v2516_v22 = vpack.c.bf16 %v2031_v61, %v2030_v20  ;;  %v1780_v41 = vadd.f32 %v3498_v42, %v1667_v30  ;;  %v1671_v46 = vadd.f32 %v1670_v38, %v3473_v15  ;;  %v2033_v59 = vmax.f32 %v1778_v62, 0.0  ;;  %v2694_v18 = vpop.f32.mrf.mxu0 }
 0x201   : > { %v1672_v26 = vpop.f32.mrf.mxu1 }
 0x202   : > { %2230 = vst [vmem:[%s3495_s5 + $0x60] sm:$0xff] %v2516_v22  ;;  %v2034_v0 = vmax.f32 %v1780_v41, 0.0  ;;  %v1784_v3 = vadd.f32 %v3503_v54, %v1671_v46  ;;  %v1673_v9 = vadd.f32 %v1672_v26, %v3478_v17  ;;  %v1943_v26 = vpop.f32.mrf.mxu0 }
 0x203   : > { %v1674_v13 = vpop.f32.mrf.mxu1 }
 0x204   : > { %v2518_v31 = vpack.c.bf16 %v2034_v0, %v2033_v59  ;;  %v1786_v19 = vadd.f32 %v3508_v63, %v1673_v9  ;;  %v1675_v21 = vadd.f32 %v1674_v13, %v3473_v15  ;;  %v2036_v24 = vmax.f32 %v1784_v3, 0.0 }
 0x205   : > { %v1676_v42 = vpop.f32.mrf.mxu1 }
 0x206   : > { %2232 = vst [vmem:[%s3495_s5 + $0x6c] sm:$0xff] %v2518_v31  ;;  %v2037_v4 = vmax.f32 %v1786_v19, 0.0  ;;  %v1788_v25 = vadd.f32 %v3515_v1, %v1675_v21  ;;  %v1677_v27 = vadd.f32 %v1676_v42, %v3478_v17  ;;  %v2695_v31 = vpop.f32.mrf.mxu0 }
 0x207   : > { %v1680_v28 = vpop.f32.mrf.mxu1 }
 0x208   : > { %v2520_v54 = vpack.c.bf16 %v2037_v4, %v2036_v24  ;;  %v1790_v29 = vadd.f32 %v3522_v5, %v1677_v27  ;;  %v1681_v32 = vadd.f32 %v1680_v28, %v3473_v15  ;;  %v2039_v34 = vmax.f32 %v1788_v25, 0.0  ;;  %v1946_v24 = vpop.f32.mrf.mxu0 }
 0x209   : > { %v1682_v63 = vpop.f32.mrf.mxu1 }
 0x20a   : > { %2234 = vst [vmem:[%s3495_s5 + $0x78] sm:$0xff] %v2520_v54  ;;  %v2040_v35 = vmax.f32 %v1790_v29, 0.0  ;;  %v1794_v7 = vadd.f32 %v1793_v8, %v1681_v32  ;;  %v1683_v36 = vadd.f32 %v1682_v63, %v3478_v17 }
 0x20b   : > { %v1684_v37 = vpop.f32.mrf.mxu1 }
 0x20c   : > { %v2522_v48 = vpack.c.bf16 %v2040_v35, %v2039_v34  ;;  %v1796_v1 = vadd.f32 %v1795_v51, %v1683_v36  ;;  %v1685_v39 = vadd.f32 %v1684_v37, %v3473_v15  ;;  %v2042_v5 = vmax.f32 %v1794_v7, 0.0 }
 0x20d   : > { %v1686_v43 = vpop.f32.mrf.mxu1 }
 0x20e   : > { %2236 = vst [vmem:[%s3495_s5 + $0x84] sm:$0xff] %v2522_v48  ;;  %v2043_v44 = vmax.f32 %v1796_v1, 0.0  ;;  %v1798_v45 = vadd.f32 %v1797_v11, %v1685_v39  ;;  %v1687_v47 = vadd.f32 %v1686_v43, %v3478_v17  ;;  %v1197_v11 = vsub.s32 2, %v3454_v6 }
 0x20f   : > { %v1690_v10 = vpop.f32.mrf.mxu1 }
 0x210   : > { %v2524_v49 = vpack.c.bf16 %v2043_v44, %v2042_v5  ;;  %v1800_v50 = vadd.f32 %v1799_v56, %v1687_v47  ;;  %v1691_v8 = vadd.f32 %v1690_v10, %v3473_v15  ;;  %v2045_v51 = vmax.f32 %v1798_v45, 0.0 }
 0x211   : > { %v1692_v52 = vpop.f32.mrf.mxu1  ;;  %v3567_v56 = vrot.slane %v3467_v12, %v1197_v11 }
 0x212   : > { %2238 = vst [vmem:[%s3495_s5 + $0x90] sm:$0xff] %v2524_v49  ;;  %v2046_v53 = vmax.f32 %v1800_v50, 0.0  ;;  %v1804_v2 = vadd.f32 %v1803_v23, %v1691_v8  ;;  %v1693_v55 = vadd.f32 %v1692_v52, %v3478_v17 }
 0x213   : > { %v1694_v57 = vpop.f32.mrf.mxu1 }
 0x214   : > { %v2526_v16 = vpack.c.bf16 %v2046_v53, %v2045_v51  ;;  %v1806_v58 = vadd.f32 %v1805_v33, %v1693_v55  ;;  %v1695_v60 = vadd.f32 %v1694_v57, %v3473_v15  ;;  %v2048_v61 = vmax.f32 %v1804_v2, 0.0  ;;  %v2698_v33 = vpop.f32.mrf.mxu0 }
 0x215   : > { %v1696_v20 = vpop.f32.mrf.mxu1 }
 0x216   : > { %2240 = vst [vmem:[%s3495_s5 + $0x9c] sm:$0xff] %v2526_v16  ;;  %v2049_v62 = vmax.f32 %v1806_v58, 0.0  ;;  %v1808_v30 = vadd.f32 %v1807_v40, %v1695_v60  ;;  %v1697_v38 = vadd.f32 %v1696_v20, %v3478_v17  ;;  %v1959_v1 = vpop.f32.mrf.mxu0 }
 0x217   : > { %v2612_v22 = vpop.f32.mrf.mxu1 }
 0x218   : > { %v2528_v41 = vpack.c.bf16 %v2049_v62, %v2048_v61  ;;  %v1810_v46 = vadd.f32 %v1809_v14, %v1697_v38  ;;  %v2051_v15 = vmax.f32 %v1808_v30, 0.0  ;;  %v2699_v10 = vpop.f32.mrf.mxu0 }
 0x219   : > { %v2613_v59 = vpop.f32.mrf.mxu1 }
 0x21a   : > { %2242 = vst [vmem:[%s3495_s5 + $0xa8] sm:$0xff] %v2528_v41  ;;  %v2052_v6 = vmax.f32 %v1810_v46, 0.0  ;;  %v2614_v0 = vadd.f32 %v2613_v59, %v2612_v22  ;;  %v1962_v2 = vpop.f32.mrf.mxu0 }
 0x21b   : > { %v2615_v3 = vpop.f32.mrf.mxu1 }
 0x21c   : > { %v2530_v9 = vpack.c.bf16 %v2052_v6, %v2051_v15  ;;  %v1847_v13 = vadd.f32 %v2614_v0, %v3567_v56  ;;  %v2702_v20 = vpop.f32.mrf.mxu0 }
 0x21d   : > { %v2616_v17 = vpop.f32.mrf.mxu1 }
 0x21e   : > { %2244 = vst [vmem:[%s3495_s5 + $0xb4] sm:$0xff] %v2530_v9  ;;  %v1944_v19 = vadd.f32 %v1943_v26, %v1847_v13  ;;  %v2617_v21 = vadd.f32 %v2616_v17, %v2615_v3  ;;  %v1975_v26 = vpop.f32.mrf.mxu0 }
 0x21f   : > { %v2618_v23 = vpop.f32.mrf.mxu1 }
 0x220   : > { %v2008_v42 = vmax.f32 %v1944_v19, 0.0  ;;  %v1850_v12 = vadd.f32 %v2617_v21, %v3567_v56 }
 0x221   : > { %v2619_v4 = vpop.f32.mrf.mxu1 }
 0x222   : > { %v2501_v25 = vpack.c.bf16 %v2008_v42, %v2008_v42  ;;  %v1947_v27 = vadd.f32 %v1946_v24, %v1850_v12  ;;  %v2620_v28 = vadd.f32 %v2619_v4, %v2618_v23 }
 0x223   : > { %v2621_v54 = vpop.f32.mrf.mxu1 }
 0x224   : > { %2215 = vst [vmem:[%s3495_s5 + $0x8] sm:$0xf] %v2501_v25  ;;  %v2011_v29 = vmax.f32 %v1947_v27, 0.0  ;;  %v1855_v32 = vadd.f32 %v2620_v28, %v3567_v56 }
 0x225   : > { %v2622_v63 = vpop.f32.mrf.mxu1 }
 0x226   : > { %v2503_v34 = vpack.c.bf16 %v2011_v29, %v2011_v29  ;;  %v1952_v35 = vadd.f32 %v2694_v18, %v1855_v32  ;;  %v2623_v7 = vadd.f32 %v2622_v63, %v2621_v54 }
 0x227   : > { %v2624_v36 = vpop.f32.mrf.mxu1 }
 0x228   : > { %2217 = vst [vmem:[%s3495_s5 + $0x14] sm:$0xf] %v2503_v34  ;;  %v2014_v37 = vmax.f32 %v1952_v35, 0.0  ;;  %v1858_v48 = vadd.f32 %v2623_v7, %v3567_v56 }
 0x229   : > { %v2625_v39 = vpop.f32.mrf.mxu1 }
 0x22a   : > { %v2505_v40 = vpack.c.bf16 %v2014_v37, %v2014_v37  ;;  %v1955_v43 = vadd.f32 %v2695_v31, %v1858_v48  ;;  %v2626_v5 = vadd.f32 %v2625_v39, %v2624_v36  ;;  %v2703_v31 = vpop.f32.mrf.mxu0 }
 0x22b   : > { %v2627_v44 = vpop.f32.mrf.mxu1 }
 0x22c   : > { %2219 = vst [vmem:[%s3495_s5 + $0x20] sm:$0xf] %v2505_v40  ;;  %v2017_v45 = vmax.f32 %v1955_v43, 0.0  ;;  %v1863_v47 = vadd.f32 %v2626_v5, %v3567_v56  ;;  %v1978_v4 = vpop.f32.mrf.mxu0 }
 0x22d   : > { %v2628_v49 = vpop.f32.mrf.mxu1 }
 0x22e   : > { %v2507_v50 = vpack.c.bf16 %v2017_v45, %v2017_v45  ;;  %v1960_v8 = vadd.f32 %v1959_v1, %v1863_v47  ;;  %v2629_v14 = vadd.f32 %v2628_v49, %v2627_v44  ;;  %v2706_v63 = vpop.f32.mrf.mxu0 }
 0x22f   : > { %v2630_v52 = vpop.f32.mrf.mxu1 }
 0x230   : > { %2221 = vst [vmem:[%s3495_s5 + $0x2c] sm:$0xf] %v2507_v50  ;;  %v2020_v51 = vmax.f32 %v1960_v8, 0.0  ;;  %v1866_v53 = vadd.f32 %v2629_v14, %v3567_v56  ;;  %v1991_v39 = vpop.f32.mrf.mxu0 }
 0x231   : > { %v2631_v55 = vpop.f32.mrf.mxu1 }
 0x232   : > { %v2509_v57 = vpack.c.bf16 %v2020_v51, %v2020_v51  ;;  %v1963_v16 = vadd.f32 %v1962_v2, %v1866_v53  ;;  %v2632_v58 = vadd.f32 %v2631_v55, %v2630_v52  ;;  %v2707_v49 = vpop.f32.mrf.mxu0 }
 0x233   : > { %v2633_v60 = vpop.f32.mrf.mxu1 }
 0x234   : > { %2223 = vst [vmem:[%s3495_s5 + $0x38] sm:$0xf] %v2509_v57  ;;  %v2023_v11 = vmax.f32 %v1963_v16, 0.0  ;;  %v1871_v18 = vadd.f32 %v2632_v58, %v3567_v56  ;;  %v1994_v55 = vpop.f32.mrf.mxu0 }
 0x235   : > { %v2634_v61 = vpop.f32.mrf.mxu1 }
 0x236   : > { %v2511_v62 = vpack.c.bf16 %v2023_v11, %v2023_v11  ;;  %v1968_v30 = vadd.f32 %v2698_v33, %v1871_v18  ;;  %v2635_v38 = vadd.f32 %v2634_v61, %v2633_v60 }
 0x237   : > { %v2636_v22 = vpop.f32.mrf.mxu1 }
 0x238   : > { %2225 = vst [vmem:[%s3495_s5 + $0x44] sm:$0xf] %v2511_v62  ;;  %v2026_v41 = vmax.f32 %v1968_v30, 0.0  ;;  %v1874_v46 = vadd.f32 %v2635_v38, %v3567_v56 }
 0x239   : > { %v2637_v59 = vpop.f32.mrf.mxu1 }
 0x23a   : > { %v2513_v15 = vpack.c.bf16 %v2026_v41, %v2026_v41  ;;  %v1971_v6 = vadd.f32 %v2699_v10, %v1874_v46  ;;  %v2638_v0 = vadd.f32 %v2637_v59, %v2636_v22 }
 0x23b   : > { %v2639_v3 = vpop.f32.mrf.mxu1 }
 0x23c   : > { %2227 = vst [vmem:[%s3495_s5 + $0x50] sm:$0xf] %v2513_v15  ;;  %v2029_v9 = vmax.f32 %v1971_v6, 0.0  ;;  %v1879_v13 = vadd.f32 %v2638_v0, %v3567_v56 }
 0x23d   : > { %v2640_v17 = vpop.f32.mrf.mxu1 }
 0x23e   : > { %v2515_v19 = vpack.c.bf16 %v2029_v9, %v2029_v9  ;;  %v1976_v21 = vadd.f32 %v1975_v26, %v1879_v13  ;;  %v2641_v23 = vadd.f32 %v2640_v17, %v2639_v3 }
 0x23f   : > { %v2642_v42 = vpop.f32.mrf.mxu1 }
 0x240   : > { %2229 = vst [vmem:[%s3495_s5 + $0x5c] sm:$0xf] %v2515_v19  ;;  %v2032_v12 = vmax.f32 %v1976_v21, 0.0  ;;  %v1882_v24 = vadd.f32 %v2641_v23, %v3567_v56 }
 0x241   : > { %v2643_v25 = vpop.f32.mrf.mxu1 }
 0x242   : > { %v2517_v27 = vpack.c.bf16 %v2032_v12, %v2032_v12  ;;  %v1979_v28 = vadd.f32 %v1978_v4, %v1882_v24  ;;  %v2644_v54 = vadd.f32 %v2643_v25, %v2642_v42 }
 0x243   : > { %v2645_v29 = vpop.f32.mrf.mxu1 }
 0x244   : > { %2231 = vst [vmem:[%s3495_s5 + $0x68] sm:$0xf] %v2517_v27  ;;  %v2035_v32 = vmax.f32 %v1979_v28, 0.0  ;;  %v1887_v33 = vadd.f32 %v2644_v54, %v3567_v56 }
 0x245   : > { %v2646_v34 = vpop.f32.mrf.mxu1 }
 0x246   : > { %v2519_v35 = vpack.c.bf16 %v2035_v32, %v2035_v32  ;;  %v1984_v7 = vadd.f32 %v2702_v20, %v1887_v33  ;;  %v2647_v36 = vadd.f32 %v2646_v34, %v2645_v29 }
 0x247   : > { %v2648_v37 = vpop.f32.mrf.mxu1 }
 0x248   : > { %2233 = vst [vmem:[%s3495_s5 + $0x74] sm:$0xf] %v2519_v35  ;;  %v2038_v48 = vmax.f32 %v1984_v7, 0.0  ;;  %v1890_v1 = vadd.f32 %v2647_v36, %v3567_v56 }
 0x249   : > { %v2649_v40 = vpop.f32.mrf.mxu1 }
 0x24a   : > { %v2521_v43 = vpack.c.bf16 %v2038_v48, %v2038_v48  ;;  %v1987_v5 = vadd.f32 %v2703_v31, %v1890_v1  ;;  %v2650_v44 = vadd.f32 %v2649_v40, %v2648_v37 }
 0x24b   : > { %v2651_v45 = vpop.f32.mrf.mxu1 }
 0x24c   : > { %2235 = vst [vmem:[%s3495_s5 + $0x80] sm:$0xf] %v2521_v43  ;;  %v2041_v47 = vmax.f32 %v1987_v5, 0.0  ;;  %v1895_v10 = vadd.f32 %v2650_v44, %v3567_v56 }
 0x24d   : > { %v2652_v50 = vpop.f32.mrf.mxu1 }
 0x24e   : > { %v2523_v8 = vpack.c.bf16 %v2041_v47, %v2041_v47  ;;  %v1992_v14 = vadd.f32 %v1991_v39, %v1895_v10  ;;  %v2653_v52 = vadd.f32 %v2652_v50, %v2651_v45 }
 0x24f   : > { %v2654_v51 = vpop.f32.mrf.mxu1 }
 0x250   : > { %2237 = vst [vmem:[%s3495_s5 + $0x8c] sm:$0xf] %v2523_v8  ;;  %v2044_v53 = vmax.f32 %v1992_v14, 0.0  ;;  %v1898_v2 = vadd.f32 %v2653_v52, %v3567_v56 }
 0x251   : > { %v2655_v57 = vpop.f32.mrf.mxu1 }
 0x252   : > { %v2525_v16 = vpack.c.bf16 %v2044_v53, %v2044_v53  ;;  %v1995_v58 = vadd.f32 %v1994_v55, %v1898_v2  ;;  %v2656_v60 = vadd.f32 %v2655_v57, %v2654_v51 }
 0x253   : > { %v2657_v11 = vpop.f32.mrf.mxu1 }
 0x254   : > { %2239 = vst [vmem:[%s3495_s5 + $0x98] sm:$0xf] %v2525_v16  ;;  %v2047_v18 = vmax.f32 %v1995_v58, 0.0  ;;  %v1903_v20 = vadd.f32 %v2656_v60, %v3567_v56 }
 0x255   : > { %v2658_v61 = vpop.f32.mrf.mxu1 }
 0x256   : > { %v2527_v62 = vpack.c.bf16 %v2047_v18, %v2047_v18  ;;  %v2000_v30 = vadd.f32 %v2706_v63, %v1903_v20  ;;  %v2659_v38 = vadd.f32 %v2658_v61, %v2657_v11 }
 0x258   : > { %2241 = vst [vmem:[%s3495_s5 + $0xa4] sm:$0xf] %v2527_v62  ;;  %v2050_v22 = vmax.f32 %v2000_v30, 0.0  ;;  %v1906_v41 = vadd.f32 %v2659_v38, %v3567_v56 }
 0x25a   : > { %v2529_v46 = vpack.c.bf16 %v2050_v22, %v2050_v22  ;;  %v2003_v26 = vadd.f32 %v2707_v49, %v1906_v41 }
 0x25c   : > { %2243 = vst [vmem:[%s3495_s5 + $0xb0] sm:$0xf] %v2529_v46  ;;  %v2053_v59 = vmax.f32 %v2003_v26, 0.0 }
 0x25e   : > { %v2531_v15 = vpack.c.bf16 %v2053_v59, %v2053_v59 }
 0x260   : > { %2245 = vst [vmem:[%s3495_s5 + $0xbc] sm:$0xf] %v2531_v15 }
 0x261 PF: > { %s14_s17 = sadd.s32 1, %s2916_s17   ;;  %s3617_s15 = smov %s2912_s16 }
 0x262   : > { %p11_p6 = scmp.ge.s32.totalorder %s14_s17, 4   ;;  %s3618_s16 = smov %s3620_s18 }
 0x264   :  { %13 = sbr.rel (!%p11_p6) target bundleno = 2 (0x2), region = 81 }

</bundles_post_ra>
